<compile_context>
chip_gen: v7x
topology: tpu7x:2x2x1
jax: 0.10.0
libtpu: 0.0.40
codegen_flags: <defaults>
</compile_context>

<pallas_src>
import jax
import jax.numpy as jnp
from jax.experimental import pallas as pl
from jax.experimental.pallas import tpu as pltpu


def _round_up(x, m):
    return (x + m - 1) // m * m


def mlp_kernel(x_ref, w1_ref, b1_ref, w2_ref, b2_ref, o_ref):
    # x arrives as f32; cast to the MXU dtype on the VPU (slack under DMA/MXU).
    x = x_ref[...].astype(w1_ref.dtype)
    # fc1: MXU matmul (bf16 in / f32 accumulate); bias + ReLU epilogue in f32.
    h = jnp.dot(x, w1_ref[...], preferred_element_type=jnp.float32)
    h = jnp.maximum(h + b1_ref[...], 0.0)                       # (TB, H_pad) f32
    # fc2: cast the activation to the MXU dtype only for the matmul.
    logits = jnp.dot(h.astype(w2_ref.dtype), w2_ref[...],
                     preferred_element_type=jnp.float32)
    logits = logits + b2_ref[...]                               # (TB, C_out) f32
    # Numerically stable softmax over the class (last) dim. If classes are
    # padded, padded columns carry a -1e30 f32 bias -> exactly zero mass.
    m = jnp.max(logits, axis=-1, keepdims=True)
    e = jnp.exp(logits - m)
    denom = jnp.sum(e, axis=-1, keepdims=True)
    inv = pl.reciprocal(denom, approx=True)                     # EUP slot, frees VALU
    o_ref[...] = (e * inv).astype(o_ref.dtype)


def two_layer_nn(x, w1, b1, w2, b2, *, block_b=1024, use_bf16=True,
                 out_dtype=jnp.bfloat16, pad_classes=False):
    """x: (B, D_in) f32; w1: (D_in, H); b1: (H,); w2: (H, C); b2: (C,)."""
    B, D_in = x.shape
    H = w1.shape[1]
    C = w2.shape[1]

    mxu_dtype = jnp.bfloat16 if use_bf16 else jnp.float32
    w_bytes = jnp.dtype(mxu_dtype).itemsize
    out_bytes = jnp.dtype(out_dtype).itemsize

    # ---- hidden dim padded to 128 lanes (one-time weight prep) --------------
    # Zero w1 columns -> ReLU(0+0)=0 -> zero w2 rows contribute nothing.
    H_pad = _round_up(H, 128)
    w1_p = jnp.zeros((D_in, H_pad), jnp.float32).at[:, :H].set(w1.astype(jnp.float32))
    b1_p = jnp.zeros((H_pad,), jnp.float32).at[:H].set(b1.astype(jnp.float32))
    w2_rows = jnp.zeros((H_pad, C), jnp.float32).at[:H, :].set(w2.astype(jnp.float32))

    # ---- class dim: unpadded by default (fewer HBM bytes, no slice pass) ----
    if pad_classes:
        # Lane-dense stores (v5e's single vst slot likes this). Padded classes
        # get -1e30 f32 bias -> zero softmax mass; sliced off afterwards.
        C_out = _round_up(C, 128)
        w2_p = jnp.zeros((H_pad, C_out), jnp.float32).at[:, :C].set(w2_rows)
        b2_p = jnp.full((C_out,), -1e30, jnp.float32).at[:C].set(b2.astype(jnp.float32))
    else:
        C_out = C
        w2_p = w2_rows
        b2_p = b2.astype(jnp.float32)

    # ---- per-chip VMEM budget ------------------------------------------------
    try:
        vmem_cap = int(pltpu.get_tpu_info().vmem_capacity_bytes)
    except Exception:
        vmem_cap = 64 << 20                       # conservative (v7x per-TC)
    vmem_budget = int(0.75 * vmem_cap)            # ~48 MiB v7x, ~96 MiB v5e/v6e

    # ---- batch tile: multiple of 8 sublanes, sized against the budget -------
    TB = max(8, min(block_b, _round_up(B, 8)))

    def vmem_working_set(tb):
        # Weights/biases are double-buffered by the default pipeline even
        # though their block never changes.
        # TODO(synk): try pipeline_mode=pl.Buffered(1) on the constant specs to
        # reclaim one weight copy if VMEM ever becomes the TB limiter.
        weights = 2 * (D_in * H_pad * w_bytes + H_pad * C_out * w_bytes
                       + (H_pad + C_out) * 4)
        streamed = 2 * tb * D_in * 4 + 2 * tb * C_out * out_bytes   # x (f32) / out
        live = tb * (D_in * w_bytes + H_pad * (4 + w_bytes) + 3 * C_out * 4)
        return weights + streamed + live

    while TB > 8 and vmem_working_set(TB) > vmem_budget:
        TB = max(8, _round_up(TB // 2, 8))

    grid = (pl.cdiv(B, TB),)                      # partial last tile is fine
    vmem_limit = int(vmem_budget)

    cost = pl.CostEstimate(
        flops=2 * B * (D_in * H_pad + H_pad * C_out),
        transcendentals=B * C_out,
        bytes_accessed=(B * D_in * 4 + D_in * H_pad * w_bytes
                        + H_pad * C_out * w_bytes + B * C_out * out_bytes),
    )

    # TODO(synk): if D_in/H ever grow so that the bf16 weights approach the
    # per-TC VMEM budget (esp. v7x, where "parallel" duplicates them per core),
    # add a K-reduction grid axis ("arbitrary") with an f32 VMEM accumulator
    # and pl.when init/finalize instead of keeping the whole weight resident.
    # TODO(synk): sweep pipeline_mode=pl.Buffered(3) on the x/out specs on v7x.
    out = pl.pallas_call(
        mlp_kernel,
        out_shape=jax.ShapeDtypeStruct((B, C_out), out_dtype),
        grid=grid,
        in_specs=[
            pl.BlockSpec((TB, D_in), lambda i: (i, 0)),      # x: streamed f32 tiles
            pl.BlockSpec((D_in, H_pad), lambda i: (0, 0)),   # w1: VMEM-resident
            pl.BlockSpec((1, H_pad), lambda i: (0, 0)),      # b1: VMEM-resident
            pl.BlockSpec((H_pad, C_out), lambda i: (0, 0)),  # w2: VMEM-resident
            pl.BlockSpec((1, C_out), lambda i: (0, 0)),      # b2: VMEM-resident
        ],
        out_specs=pl.BlockSpec((TB, C_out), lambda i: (i, 0)),
        compiler_params=pltpu.CompilerParams(
            dimension_semantics=("parallel",),               # megacore split on v7x
            vmem_limit_bytes=vmem_limit,
        ),
        cost_estimate=cost,
    )(x.astype(jnp.float32),
      w1_p.astype(mxu_dtype), b1_p.reshape(1, H_pad),
      w2_p.astype(mxu_dtype), b2_p.reshape(1, C_out))

    if pad_classes and C_out != C:
        out = out[:, :C]
    return out


if __name__ == "__main__":
    # Small, module-consistent shapes: batch=8, input_dim=32, hidden=64, classes=16
    B, D_in, H, C = 8, 32, 64, 16

    key = jax.random.PRNGKey(0)
    kx, kw1, kb1, kw2, kb2 = jax.random.split(key, 5)

    x = jax.random.normal(kx, (B, D_in), dtype=jnp.float32)
    # Deterministic parameter init (PyTorch-style scale); stored as (in, out).
    w1 = jax.random.uniform(kw1, (D_in, H), jnp.float32, -1.0, 1.0) / jnp.sqrt(D_in)
    b1 = jax.random.uniform(kb1, (H,), jnp.float32, -1.0, 1.0) / jnp.sqrt(D_in)
    w2 = jax.random.uniform(kw2, (H, C), jnp.float32, -1.0, 1.0) / jnp.sqrt(H)
    b2 = jax.random.uniform(kb2, (C,), jnp.float32, -1.0, 1.0) / jnp.sqrt(H)

    out = two_layer_nn(x, w1, b1, w2, b2)
    out = jax.block_until_ready(out)

    # Reference with matching bf16 matmul inputs / f32 accumulation.
    xb, w1b, w2b = (a.astype(jnp.bfloat16) for a in (x, w1, w2))
    h_ref = jnp.maximum(
        jnp.dot(xb, w1b, preferred_element_type=jnp.float32) + b1, 0.0)
    logits_ref = jnp.dot(h_ref.astype(jnp.bfloat16), w2b,
                         preferred_element_type=jnp.float32) + b2
    ref = jax.nn.softmax(logits_ref, axis=1)

    out_f32 = out.astype(jnp.float32)
    assert out.shape == (B, C)
    # Tolerance covers the bf16 output quantization (~1%) and the EUP approx
    # reciprocal (~1e-3 relative) in the softmax denominator.
    assert jnp.allclose(out_f32, ref, atol=2e-2, rtol=2e-2), \
        float(jnp.max(jnp.abs(out_f32 - ref)))
    assert jnp.allclose(jnp.sum(out_f32, axis=1), 1.0, atol=2e-2)

    print("KERNEL_OK")
</pallas_src>

<mosaic_0001>
module attributes {stable_mosaic.version = 11 : i64} {
  func.func @mlp_kernel(%arg0: i32, %arg1: memref<8x32xf32, #tpu.memory_space<vmem>>, %arg2: memref<32x128xbf16, #tpu.memory_space<vmem>>, %arg3: memref<1x128xf32, #tpu.memory_space<vmem>>, %arg4: memref<128x16xbf16, #tpu.memory_space<vmem>>, %arg5: memref<1x16xf32, #tpu.memory_space<vmem>>, %arg6: memref<8x16xbf16, #tpu.memory_space<vmem>>) attributes {dimension_semantics = [#tpu.dimension_semantics<parallel>], iteration_bounds = array<i64: 1>, scalar_prefetch = 0 : i64, scratch_operands = 0 : i64, tpu.core_type = #tpu.core_type<tc>, window_params = [{transform_indices = @transform_0, window_bounds = array<i64: 8, 32>}, {pipeline_mode = #tpu.pipeline_mode<synchronous>, transform_indices = @transform_1, window_bounds = array<i64: 32, 128>}, {pipeline_mode = #tpu.pipeline_mode<synchronous>, transform_indices = @transform_2, window_bounds = array<i64: 1, 128>}, {pipeline_mode = #tpu.pipeline_mode<synchronous>, transform_indices = @transform_3, window_bounds = array<i64: 128, 16>}, {pipeline_mode = #tpu.pipeline_mode<synchronous>, transform_indices = @transform_4, window_bounds = array<i64: 1, 16>}, {transform_indices = @transform_5, window_bounds = array<i64: 8, 16>}]} {
    %c0 = arith.constant 0 : index
    %c0_0 = arith.constant 0 : index
    %0 = vector.load %arg1[%c0, %c0_0] : memref<8x32xf32, #tpu.memory_space<vmem>>, vector<8x32xf32>
    %1 = arith.truncf %0 : vector<8x32xf32> to vector<8x32xbf16>
    %c0_1 = arith.constant 0 : index
    %c0_2 = arith.constant 0 : index
    %2 = vector.load %arg2[%c0_1, %c0_2] : memref<32x128xbf16, #tpu.memory_space<vmem>>, vector<32x128xbf16>
    %cst = arith.constant dense<0.000000e+00> : vector<8x128xf32>
    %3 = tpu.matmul %1, %2, %cst {dimension_numbers = #tpu.dot_dimension_numbers<[1], [0], [0], [1], [0, 0, 1, 1], [], []>} : vector<8x32xbf16>, vector<32x128xbf16>, vector<8x128xf32> -> vector<8x128xf32>
    %c0_3 = arith.constant 0 : index
    %c0_4 = arith.constant 0 : index
    %4 = vector.load %arg3[%c0_3, %c0_4] : memref<1x128xf32, #tpu.memory_space<vmem>>, vector<1x128xf32>
    %5 = vector.broadcast %4 : vector<1x128xf32> to vector<8x128xf32>
    %6 = arith.addf %3, %5 : vector<8x128xf32>
    %cst_5 = arith.constant 0.000000e+00 : f32
    %7 = vector.broadcast %cst_5 : f32 to vector<8x128xf32>
    %8 = arith.maximumf %6, %7 : vector<8x128xf32>
    %9 = arith.truncf %8 : vector<8x128xf32> to vector<8x128xbf16>
    %c0_6 = arith.constant 0 : index
    %c0_7 = arith.constant 0 : index
    %10 = vector.load %arg4[%c0_6, %c0_7] : memref<128x16xbf16, #tpu.memory_space<vmem>>, vector<128x16xbf16>
    %cst_8 = arith.constant dense<0.000000e+00> : vector<8x16xf32>
    %11 = tpu.matmul %9, %10, %cst_8 {dimension_numbers = #tpu.dot_dimension_numbers<[1], [0], [0], [1], [0, 0, 1, 1], [], []>} : vector<8x128xbf16>, vector<128x16xbf16>, vector<8x16xf32> -> vector<8x16xf32>
    %c0_9 = arith.constant 0 : index
    %c0_10 = arith.constant 0 : index
    %12 = vector.load %arg5[%c0_9, %c0_10] : memref<1x16xf32, #tpu.memory_space<vmem>>, vector<1x16xf32>
    %13 = vector.broadcast %12 : vector<1x16xf32> to vector<8x16xf32>
    %14 = arith.addf %11, %13 : vector<8x16xf32>
    %cst_11 = arith.constant dense<0xFF800000> : vector<8xf32>
    %15 = vector.multi_reduction <maximumf>, %14, %cst_11 [1] : vector<8x16xf32> to vector<8xf32>
    %16 = vector.shape_cast %15 : vector<8xf32> to vector<8x1xf32>
    %17 = vector.broadcast %16 : vector<8x1xf32> to vector<8x16xf32>
    %18 = arith.subf %14, %17 : vector<8x16xf32>
    %19 = math.exp %18 : vector<8x16xf32>
    %cst_12 = arith.constant dense<0.000000e+00> : vector<8xf32>
    %20 = vector.multi_reduction <add>, %19, %cst_12 [1] : vector<8x16xf32> to vector<8xf32>
    %21 = vector.shape_cast %20 : vector<8xf32> to vector<8x1xf32>
    %22 = tpu.reciprocal %21 {approx = true} : vector<8x1xf32> -> vector<8x1xf32>
    %23 = vector.broadcast %22 : vector<8x1xf32> to vector<8x16xf32>
    %24 = arith.mulf %19, %23 : vector<8x16xf32>
    %25 = arith.truncf %24 : vector<8x16xf32> to vector<8x16xbf16>
    %c0_13 = arith.constant 0 : index
    %c0_14 = arith.constant 0 : index
    %26 = vector.load %arg6[%c0_13, %c0_14] : memref<8x16xbf16, #tpu.memory_space<vmem>>, vector<8x16xbf16>
    tpu.vector_store %arg6[%c0_13, %c0_14], %25 {strides = array<i32>} : memref<8x16xbf16, #tpu.memory_space<vmem>>, vector<8x16xbf16>,
    return
  }
  func.func @transform_0(%arg0: i32) -> (i32, i32) {
    %c0_i32 = arith.constant 0 : i32
    %c0_i32_0 = arith.constant 0 : i32
    return %arg0, %c0_i32 : i32, i32
  }
  func.func @transform_1(%arg0: i32) -> (i32, i32) {
    %c0_i32 = arith.constant 0 : i32
    %c0_i32_0 = arith.constant 0 : i32
    %c0_i32_1 = arith.constant 0 : i32
    return %c0_i32, %c0_i32_0 : i32, i32
  }
  func.func @transform_2(%arg0: i32) -> (i32, i32) {
    %c0_i32 = arith.constant 0 : i32
    %c0_i32_0 = arith.constant 0 : i32
    %c0_i32_1 = arith.constant 0 : i32
    return %c0_i32, %c0_i32_0 : i32, i32
  }
  func.func @transform_3(%arg0: i32) -> (i32, i32) {
    %c0_i32 = arith.constant 0 : i32
    %c0_i32_0 = arith.constant 0 : i32
    %c0_i32_1 = arith.constant 0 : i32
    return %c0_i32, %c0_i32_0 : i32, i32
  }
  func.func @transform_4(%arg0: i32) -> (i32, i32) {
    %c0_i32 = arith.constant 0 : i32
    %c0_i32_0 = arith.constant 0 : i32
    %c0_i32_1 = arith.constant 0 : i32
    return %c0_i32, %c0_i32_0 : i32, i32
  }
  func.func @transform_5(%arg0: i32) -> (i32, i32) {
    %c0_i32 = arith.constant 0 : i32
    %c0_i32_0 = arith.constant 0 : i32
    return %arg0, %c0_i32 : i32, i32
  }
}

</mosaic_0001>

<bundles_post_ra>
// kernel: tpu_custom_call.1
= control target key start
LH: loop header
LB: loop body
LE: loop exit
PB: predicated region body
PF: predicated region fallthrough
CT: control target
= control target key end

     0   :  { %v327_v1 = vmov 0.0   ;;  %vm328_vm0 = vmmov 0   ;;  %vm47_vm1 = vcmask 261120   ;;  %s411_s0 = inlined_call_operand.vmem [shape: f32[8,32], index: 0, kind: input, shape index: {}]   ;;  %s412_s1 = inlined_call_operand.vmem [shape: bf16[32,128], index: 1, kind: input, shape index: {}]   ;;  %s413_s2 = inlined_call_operand.vmem [shape: f32[1,128], index: 2, kind: input, shape index: {}]   ;;  %s414_s3 = inlined_call_operand.vmem [shape: bf16[128,16], index: 3, kind: input, shape index: {}]   ;;  %s415_s4 = inlined_call_operand.vmem [shape: f32[1,16], index: 4, kind: input, shape index: {}]   ;;  %s416_s5 = inlined_call_operand.hbm [shape: bf16[8,16], index: 5, kind: output, shape index: {}]  }
   0x1   :  { %v289_v0 = vld [vmem:[%s412_s1] sm:$0xff]   ;;  %258 = vmatprep.subr.bf16.mxu0 %v327_v1  ;;  %v290_v2 = vld [vmem:[%s412_s1 + $0x8] sm:$0xff]   ;;  %266 = vmatprep.subr.bf16.mxu1 %v327_v1  ;;  %v293_v7 = vld [vmem:[%s414_s3 + $0x10] sm:$0xff]  }
   0x2   :  { %259 = vmatpush3.bf16.msra.mxu0 %v289_v0  ;;  %262 = vmatprep.mubr.msk.bf16.mxu0 %vm328_vm0, %v327_v1  ;;  %v22_v3 = vld [vmem:[%s411_s0] sm:$0xff]  ;;  %v292_v6 = vld [vmem:[%s414_s3 + $0x8] sm:$0xff]  }
   0x3   :  { %260 = vmatprep.subr.bf16.mxu0 %v327_v1  ;;  %v291_v4 = vld [vmem:[%s414_s3] sm:$0xff]   ;;  %282 = vmatprep.mubr.msk.bf16.mxu1 %vm328_vm0, %v327_v1  ;;  %v23_v5 = vpack.c.bf16 %v22_v3, %v22_v3 }
   0x4   :  { %267 = vmatpush3.bf16.msra.mxu1 %v291_v4 }
   0x5   :  { %268 = vmatprep.subr.bf16.mxu1 %v327_v1 }
   0x6   :  { %261 = vmatpush3.bf16.msra.mxu0 %v290_v2 }
   0x8   :  { %269 = vmatpush3.bf16.msra.mxu1 %v292_v6 }
   0x9   :  { %263 = vmatmul.mubr.msk.bf16.vlgmr.msra.gmra.mrb[0].mxu0 %vm47_vm1, %v23_v5  ;;  %270 = vmatprep.subr.bf16.mxu1 %v327_v1 }
   0xa   :  { %10 = vsyncpa [#allocation3], 0  ;;  %v294_v8 = vld [vmem:[%s414_s3 + $0x18] sm:$0xff]   ;;  %v295_v9 = vld [vmem:[%s414_s3 + $0x20] sm:$0xff]   ;;  %vm204_vm2 = vcmask 130048   ;;  %vm217_vm3 = vcmask 125952  }
   0xb   :  { %v296_v10 = vld [vmem:[%s414_s3 + $0x28] sm:$0xff]   ;;  %v297_v11 = vld [vmem:[%s414_s3 + $0x30] sm:$0xff]   ;;  %v298_v12 = vld [vmem:[%s414_s3 + $0x38] sm:$0xff]  }
   0xc   :  { %271 = vmatpush3.bf16.msra.mxu1 %v293_v7  ;;  %v233_v13 = vld [vmem:[%s413_s2] ss:$0 sm:$0xff]  ;;  %s329_s2 = smov [#allocation2]  }
   0xd   :  { %272 = vmatprep.subr.bf16.mxu1 %v327_v1  ;;  %v237_v21 = vld [vmem:[%s415_s4] ss:$0 sm:$0xff]  ;;  %s225_s3 = sshll.u32 %s329_s2, 4  ;;  %s226_s3 = int_to_ptr.vmem [resolvable:$true] %s225_s3 }
   0xe   :  { %s303_s4 = scalar_lea.vmem %s226_s3, 64  ;;  %p308_p1 = scmp.lt.s32.totalorder %s226_s3, %s226_s3 }
   0xf   :  { %p304_p0 = scmp.ne.s32.totalorder %s226_s3, %s303_s4  ;;  %p309_p2 = scmp.lt.s32.totalorder %s303_s4, %s303_s4 }
  0x10   :  { %273 = vmatpush3.bf16.msra.mxu1 %v294_v8 }
  0x11   :  { %274 = vmatprep.subr.bf16.mxu1 %v327_v1  ;;  %p310_p3 = por %p309_p2, %p308_p1 }
  0x13   :  { %p311_p4 = pnand %p310_p3, %p304_p0 }
  0x14   :  { %275 = vmatpush3.bf16.msra.mxu1 %v295_v9 }
  0x15   :  { %276 = vmatprep.subr.bf16.mxu1 %v327_v1 }
  0x18   :  { %277 = vmatpush3.bf16.msra.mxu1 %v296_v10 }
  0x19   :  { %278 = vmatprep.subr.bf16.mxu1 %v327_v1 }
  0x1c   :  { %279 = vmatpush3.bf16.msra.mxu1 %v297_v11 }
  0x1d   :  { %280 = vmatprep.subr.bf16.mxu1 %v327_v1 }
  0x20   :  { %281 = vmatpush3.bf16.msra.mxu1 %v298_v12 }
  0xdc   :  { %v85_v14 = vpop.f32.mrb[0].mxu0 }
  0xdd   :  { %v86_v15 = vadd.f32 %v233_v13, %v85_v14  ;;  %v264_v16 = vpop.f32.mrb[1].mxu0 }
  0xde   :  { %v88_v17 = vpop.f32.mrb[2].mxu0 }
  0xdf   :  { %v91_v18 = vmax.f32 %v86_v15, 0.0  ;;  %v265_v19 = vpop.f32.mrb[3].mxu0 }
  0xe1   :  { %v92_v20 = vpack.c.bf16 %v91_v18, %v91_v18 }
  0xe3   :  { %283 = vmatmul.mubr.bf16.vlgmr.msra.gmra.mrb[0].mxu1 %v92_v20 }
 0x1b6   :  { %v198_v22 = vpop.f32.mrb[0].mxu1 }
 0x1b7   :  { %v199_v23 = vadd.f32 %v237_v21, %v198_v22  ;;  %v284_v24 = vpop.f32.mrb[1].mxu1 }
 0x1b8   :  { %v201_v25 = vpop.f32.mrb[2].mxu1 }
 0x1b9   :  { %v285_v26 = vpop.f32.mrb[3].mxu1  ;;  %v205_v27 = vsel %vm204_vm2, %v199_v23, -inf }
 0x1ba   :  { %206 = vmax.xlane.f32.xlu0 %v205_v27 }
 0x247   :  { %v207_v28 = vpop.xlane.xlu0 %206 }
 0x248   :  { %v208_v29 = vsub.f32 %v199_v23, %v207_v28 }
 0x24a   :  { %v209_v30 = vmul.f32 1.442695, %v208_v29 }
 0x24c   :  { %299 = vpow2.f32 %v209_v30 }
 0x256   :  { %v300_v31 = vpop.eup %299 }
 0x257   :  { %v211_v32 = vsel %vm204_vm2, %v300_v31, 0.0 }
 0x258   :  { %212 = vadd.xlane.f32.xlu0 %v211_v32 }
 0x2e5   :  { %v213_v33 = vpop.xlane.xlu0 %212 }
 0x2e6   :  { %301 = vrcp.f32 %v213_v33 }
 0x2f0   :  { %v302_v34 = vpop.eup %301 }
 0x2f1   :  { %v215_v35 = vmul.f32 %v302_v34, %v300_v31 }
 0x2f3   :  { %v216_v36 = vpack.c.bf16 %v215_v35, %v215_v35 }
 0x2f5   :  { %218 = vst.msk [vmem:[#allocation2] sm:$0xf] %vm217_vm3, %v216_v36 }
 0x2f6   :  { %314 = shalt.err (!%p311_p4)
}
 0x2f7   :  { %s315_s19 = scalar_lea.hbm %s416_s5, 64 }
 0x2f8   :  { %p316_p5 = scmp.ne.s32.totalorder %s416_s5, %s315_s19  ;;  %p319_p6 = scmp.lt.u32.totalorder %s315_s19, %s416_s5 }
 0x2fa   :  { %p321_p7 = pnand %p319_p6, %p316_p5 }
 0x2fc   :  { %324 = shalt.err (!%p321_p7)
}
 0x2fd   :  { %228 = dma.vmem_to_hbm [thread:$0]  %s226_s3, 64, %s416_s5, [#allocation3]  }
 0x2fe   :  { %325 = dma.done.wait [#allocation3], 64  }
 0x2ff   :  { %326 = vsyncadd [#allocation3], 4294967232 }
 0x300   :  { %232 = vsyncpa [#allocation3], 1 }

</bundles_post_ra>
